<compile_context>
chip_gen: v6e
topology: v6e:2x2x1
jax: 0.10.0
libtpu: 0.0.40
codegen_flags: <defaults>
</compile_context>

<pallas_src>
import jax
import jax.numpy as jnp
from jax.experimental import pallas as pl
from jax.experimental.pallas import tpu as pltpu

LANES = 128  # vreg lane width


def _fma_kernel(params_ref, x_ref, o_ref):
    # params_ref: SMEM f32[2] = [w, b]  (folded affine: y = x*w + b)
    w = params_ref[0]
    b = params_ref[1]
    x = x_ref[...].astype(jnp.float32)       # per-vreg upcast (free VPU slot)
    o_ref[...] = (x * w + b).astype(o_ref.dtype)


def two_linear(x, w1, b1, w2, b2, *, tile_rows=4096, force_pallas=False,
               small_n_threshold=1 << 16):
    """Applies Linear(1,1) -> Linear(1,1) elementwise.

    x: array of shape [..., 1] (or any shape; treated elementwise).
    Returns an array of the same shape/dtype as x.
    """
    orig_shape = x.shape
    orig_dtype = x.dtype
    total = x.size

    # Fold the two affines into a single FMA on the host (scalar math).
    w = jnp.asarray(w1, jnp.float32) * jnp.asarray(w2, jnp.float32)
    b = (jnp.asarray(b1, jnp.float32) * jnp.asarray(w2, jnp.float32)
         + jnp.asarray(b2, jnp.float32))

    # Small-N fast path: a fused XLA elementwise op beats kernel launch
    # overhead for tiny inputs.
    if total < small_n_threshold and not force_pallas:
        y = x.astype(jnp.float32) * w + b
        return y.astype(orig_dtype)

    params = jnp.stack([w, b])  # f32[2] -> SMEM

    # Keep HBM traffic in the native dtype for float inputs (bf16 stays 2 B/elem);
    # integer inputs go through f32 (Linear semantics imply float math anyway).
    if jnp.issubdtype(orig_dtype, jnp.floating):
        io_dtype = orig_dtype
    else:
        io_dtype = jnp.float32

    flat = x.reshape(-1).astype(io_dtype)

    # Lane-dense [rows, 128] view. Pad only the (<=127 elem) ragged tail.
    rows = pl.cdiv(total, LANES)
    padded = rows * LANES
    if padded != total:
        flat = jnp.pad(flat, (0, padded - total))
    x2d = flat.reshape(rows, LANES)

    # Tile: multiple of 8 sublanes (or the full row count when rows < 8),
    # capped so the grid has >= 2 steps where possible (v7x megacore sharding),
    # and at most tile_rows (2 MiB f32 blocks by default).
    if rows <= 8:
        tile = rows
    else:
        tile = max(8, (min(tile_rows, rows) // 8) * 8)
        half = (rows // 2) // 8 * 8
        if half >= 8:
            tile = min(tile, half)

    grid = (pl.cdiv(rows, tile),)

    out2d = pl.pallas_call(
        _fma_kernel,
        out_shape=jax.ShapeDtypeStruct((rows, LANES), io_dtype),
        grid=grid,
        in_specs=[
            pl.BlockSpec(memory_space=pltpu.SMEM),            # folded [w, b]
            pl.BlockSpec((tile, LANES), lambda i: (i, 0)),     # x tile
        ],
        out_specs=pl.BlockSpec((tile, LANES), lambda i: (i, 0)),
        compiler_params=pltpu.CompilerParams(
            dimension_semantics=("parallel",),
        ),
    )(params, x2d)

    out_flat = out2d.reshape(-1)
    if padded != total:
        out_flat = out_flat[:total]
    return out_flat.reshape(orig_shape).astype(orig_dtype)


if __name__ == "__main__":
    key = jax.random.PRNGKey(0)
    kx, k1, k2, kb = jax.random.split(key, 4)

    # Deterministic parameter init (fan_in = 1 -> uniform(-1, 1) range).
    w1, b1 = jax.random.uniform(k1, (2,), minval=-1.0, maxval=1.0)
    w2, b2 = jax.random.uniform(k2, (2,), minval=-1.0, maxval=1.0)

    def ref_fn(x):
        return ((x.astype(jnp.float32) * w1 + b1) * w2 + b2)

    # 1) Tiny input consistent with the module (batch=8, feature=1): fast path.
    x_small = jax.random.normal(kx, (8, 1), dtype=jnp.float32)
    out_small = two_linear(x_small, w1, b1, w2, b2)
    jax.block_until_ready(out_small)
    assert out_small.shape == x_small.shape
    assert jnp.allclose(out_small, ref_fn(x_small), atol=1e-6)

    # 2) Lane-aligned f32 input through the Pallas kernel (total % 128 == 0:
    #    no pad, no slice).
    x_aligned = jax.random.normal(kx, (1024, 1), dtype=jnp.float32)
    out_aligned = two_linear(x_aligned, w1, b1, w2, b2, force_pallas=True)
    jax.block_until_ready(out_aligned)
    assert out_aligned.shape == x_aligned.shape
    assert jnp.allclose(out_aligned, ref_fn(x_aligned), atol=1e-6)

    # 3) Ragged N (not a multiple of 128): verifies masked partial last block.
    x_ragged = jax.random.normal(kb, (1000, 1), dtype=jnp.float32)
    out_ragged = two_linear(x_ragged, w1, b1, w2, b2, force_pallas=True)
    jax.block_until_ready(out_ragged)
    assert out_ragged.shape == x_ragged.shape
    assert jnp.allclose(out_ragged, ref_fn(x_ragged), atol=1e-6)

    # 4) bf16 input: HBM traffic stays bf16; cast happens inside the kernel.
    #    Also exercises a multi-step grid (rows=16 -> tile=8 -> 2 steps).
    x_bf16 = jax.random.normal(kb, (2048, 1), dtype=jnp.float32).astype(jnp.bfloat16)
    out_bf16 = two_linear(x_bf16, w1, b1, w2, b2, force_pallas=True)
    jax.block_until_ready(out_bf16)
    assert out_bf16.dtype == jnp.bfloat16
    assert out_bf16.shape == x_bf16.shape
    assert jnp.allclose(out_bf16.astype(jnp.float32), ref_fn(x_bf16),
                        atol=5e-2, rtol=5e-2)

    print("KERNEL_OK")
</pallas_src>

<mosaic_0001>
module attributes {stable_mosaic.version = 11 : i64} {
  func.func @_fma_kernel(%arg0: i32, %arg1: memref<2xf32, #tpu.memory_space<smem>>, %arg2: memref<8x128xf32, #tpu.memory_space<vmem>>, %arg3: memref<8x128xf32, #tpu.memory_space<vmem>>) attributes {dimension_semantics = [#tpu.dimension_semantics<parallel>], iteration_bounds = array<i64: 1>, scalar_prefetch = 0 : i64, scratch_operands = 0 : i64, tpu.core_type = #tpu.core_type<tc>, window_params = [{transform_indices = @transform_0, window_bounds = array<i64: 2>}, {transform_indices = @transform_1, window_bounds = array<i64: 8, 128>}, {transform_indices = @transform_2, window_bounds = array<i64: 8, 128>}]} {
    %c0 = arith.constant 0 : index
    %0 = memref.load %arg1[%c0] : memref<2xf32, #tpu.memory_space<smem>>
    %c1 = arith.constant 1 : index
    %1 = memref.load %arg1[%c1] : memref<2xf32, #tpu.memory_space<smem>>
    %c0_0 = arith.constant 0 : index
    %c0_1 = arith.constant 0 : index
    %2 = vector.load %arg2[%c0_0, %c0_1] : memref<8x128xf32, #tpu.memory_space<vmem>>, vector<8x128xf32>
    %3 = vector.broadcast %0 : f32 to vector<8x128xf32>
    %4 = arith.mulf %2, %3 : vector<8x128xf32>
    %5 = vector.broadcast %1 : f32 to vector<8x128xf32>
    %6 = arith.addf %4, %5 : vector<8x128xf32>
    %c0_2 = arith.constant 0 : index
    %c0_3 = arith.constant 0 : index
    %7 = vector.load %arg3[%c0_2, %c0_3] : memref<8x128xf32, #tpu.memory_space<vmem>>, vector<8x128xf32>
    tpu.vector_store %arg3[%c0_2, %c0_3], %6 {strides = array<i32>} : memref<8x128xf32, #tpu.memory_space<vmem>>, vector<8x128xf32>,
    return
  }
  func.func @transform_0(%arg0: i32) -> i32 {
    %c0_i32 = arith.constant 0 : i32
    %c0_i32_0 = arith.constant 0 : i32
    return %c0_i32 : i32
  }
  func.func @transform_1(%arg0: i32) -> (i32, i32) {
    %c0_i32 = arith.constant 0 : i32
    %c0_i32_0 = arith.constant 0 : i32
    return %arg0, %c0_i32 : i32, i32
  }
  func.func @transform_2(%arg0: i32) -> (i32, i32) {
    %c0_i32 = arith.constant 0 : i32
    %c0_i32_0 = arith.constant 0 : i32
    return %arg0, %c0_i32 : i32, i32
  }
}

</mosaic_0001>

<bundles_post_ra>
// kernel: tpu_custom_call.1
= control target key start
LH: loop header
LB: loop body
LE: loop exit
PB: predicated region body
PF: predicated region fallthrough
CT: control target
= control target key end

     0   :  { %7 = vsyncpa [#allocation5], 0  ;;  %s144_s0 = inlined_call_operand.hbm [shape: f32[2], index: 0, kind: input, shape index: {}]   ;;  %s145_s1 = inlined_call_operand.hbm [shape: f32[8,128], index: 1, kind: input, shape index: {}]   ;;  %s146_s2 = inlined_call_operand.hbm [shape: f32[8,128], index: 2, kind: output, shape index: {}]  }
   0x1   :  { %8 = vsyncpa [#allocation3], 0 }
   0x2   :  { %9 = vsyncpa [#allocation4], 0  ;;  %s117_s9 = smov [#allocation2]   ;;  %s118_s12 = smov [#allocation6]  }
   0x3   :  { %17 = dma.hbm_to_smem %s144_s0, 16, %s117_s9, [#allocation5]  }
   0x4   :  { %s24_s13 = sshll.u32 %s118_s12, 4  ;;  %s25_s13 = int_to_ptr.vmem [resolvable:$true] %s24_s13 }
   0x5   :  { %s79_s14 = scalar_lea.vmem %s25_s13, 128  ;;  %p84_p1 = scmp.lt.s32.totalorder %s25_s13, %s25_s13 }
   0x6   :  { %p80_p0 = scmp.ne.s32.totalorder %s25_s13, %s79_s14  ;;  %p85_p2 = scmp.lt.s32.totalorder %s79_s14, %s79_s14 }
   0x8   :  { %p86_p3 = por %p85_p2, %p84_p1 }
   0xa   :  { %p87_p4 = pnand %p86_p3, %p80_p0 }
   0xc   :  { %90 = shalt.err (!%p87_p4)
}
   0xd   :  { %27 = dma.hbm_to_vmem [thread:$0]  %s145_s1, 128, %s25_s13, [#allocation3]  }
   0xe   :  { %111 = dma.done.wait [#allocation5], 16  }
   0xf   :  { %112 = vsyncadd [#allocation5], 4294967280 }
  0x10   :  { %113 = dma.done.wait [#allocation3], 128  }
  0x11   :  { %114 = vsyncadd [#allocation3], 4294967168 }
  0x12   :  { %34 = sfence }
  0x13   :  { %s35_s0 = sld [smem:[#allocation2]]  ;;  %v37_v0 = vld [vmem:[#allocation6] sm:$0xff]  ;;  %s119_s18 = smov [#allocation7]  }
  0x14   :  { %s59_s17 = sld [smem:[#allocation2 + $0x1]]  ;;  %s49_s19 = sshll.u32 %s119_s18, 4  ;;  %s50_s19 = int_to_ptr.vmem [resolvable:$true] %s49_s19 }
  0x15   :  { %s91_s20 = scalar_lea.vmem %s50_s19, 128  ;;  %p96_p6 = scmp.lt.s32.totalorder %s50_s19, %s50_s19 }
  0x16   :  { %p92_p5 = scmp.ne.s32.totalorder %s50_s19, %s91_s20  ;;  %p97_p7 = scmp.lt.s32.totalorder %s91_s20, %s91_s20 }
  0x18   :  { %p98_p8 = por %p97_p7, %p96_p6 }
  0x19   :  { %v38_v1 = vstv %s35_s0 }
  0x1a   :  { %v39_v2 = vmul.f32 %v38_v1, %v37_v0  ;;  %v40_v3 = vstv %s59_s17  ;;  %p99_p9 = pnand %p98_p8, %p92_p5 }
  0x1c   :  { %v41_v4 = vadd.f32 %v40_v3, %v39_v2 }
  0x1e   :  { %42 = vst [vmem:[#allocation7] sm:$0xff] %v41_v4 }
  0x1f   :  { %102 = shalt.err (!%p99_p9)
}
  0x20   :  { %52 = dma.vmem_to_hbm [thread:$0]  %s50_s19, 128, %s146_s2, [#allocation4]  }
  0x21   :  { %115 = dma.done.wait [#allocation4], 128  }
  0x22   :  { %116 = vsyncadd [#allocation4], 4294967168 }
  0x23   :  { %56 = vsyncpa [#allocation3], 1 }
  0x24   :  { %57 = vsyncpa [#allocation4], 1 }
  0x25   :  { %58 = vsyncpa [#allocation5], 1 }

</bundles_post_ra>
